<compile_context>
chip_gen: v6e
topology: v6e:2x2x1
jax: 0.10.0
libtpu: 0.0.40
codegen_flags: <defaults>
</compile_context>

<pallas_src>
import functools

import jax
import jax.numpy as jnp
import numpy as np
from jax.experimental import pallas as pl
from jax.experimental.pallas import tpu as pltpu


def _fspecial_gauss_1d(size: int, sigma: float) -> jnp.ndarray:
    """1-D Gaussian window, normalized to sum to 1 (matches torch version)."""
    coords = jnp.arange(size, dtype=jnp.float32) - (size // 2)
    g = jnp.exp(-(coords ** 2) / (2.0 * sigma ** 2))
    return g / jnp.sum(g)


def _blur_matrices(g: jnp.ndarray, H: int, W: int):
    """Dense 'valid' correlation matrices A_h (H_out, H) and A_w (W, W_out)."""
    win = g.shape[0]
    H_out = H - win + 1
    W_out = W - win + 1
    assert H_out > 0 and W_out > 0, "spatial dims must be >= win_size"
    idx_h = jnp.arange(H)[None, :] - jnp.arange(H_out)[:, None]
    A_h = jnp.where((idx_h >= 0) & (idx_h < win),
                    g[jnp.clip(idx_h, 0, win - 1)], 0.0).astype(jnp.float32)
    idx_w = jnp.arange(W)[:, None] - jnp.arange(W_out)[None, :]
    A_w = jnp.where((idx_w >= 0) & (idx_w < win),
                    g[jnp.clip(idx_w, 0, win - 1)], 0.0).astype(jnp.float32)
    return A_h, A_w


def _ssim_kernel(x_ref, y_ref, ah_ref, aw_ref, o_ref, *,
                 C1, C2, shift, inv_norm, blur_dtype):
    # x_ref / y_ref : (H, W) — one channel of one image (leading dims squeezed).
    f32 = jnp.float32

    # Exact pre-centering: window weights sum to 1, so blur(x) = blur(xc)+shift
    # and all sigma terms are shift-invariant.  This keeps bf16 MXU operands
    # numerically safe at data_range=255 and also helps the f32 path.
    xc = x_ref[...].astype(f32) - shift
    yc = y_ref[...].astype(f32) - shift

    ah = ah_ref[...]          # (H_out, H), blur_dtype
    aw = aw_ref[...]          # (W, W_out), blur_dtype

    def blur(p):
        # Separable valid blur; shared 1-D matrices (no kron), f32 accumulation.
        t = jnp.dot(p.astype(blur_dtype), aw,
                    preferred_element_type=f32)                 # (H, W_out)
        return jnp.dot(ah, t.astype(blur_dtype),
                       preferred_element_type=f32)              # (H_out, W_out)

    mu1c = blur(xc)
    mu2c = blur(yc)
    sigma1_sq = blur(xc * xc) - mu1c * mu1c
    sigma2_sq = blur(yc * yc) - mu2c * mu2c
    sigma12 = blur(xc * yc) - mu1c * mu2c

    mu1 = mu1c + shift
    mu2 = mu2c + shift

    # ssim = ((2*mu1mu2+C1)/(mu1^2+mu2^2+C1)) * ((2*s12+C2)/(s1+s2+C2)),
    # fused into one EUP approximate reciprocal + one Newton-Raphson step
    # (near-f32 accuracy, divide off the VPU critical path).  Epilogue is f32.
    num = (2.0 * mu1 * mu2 + C1) * (2.0 * sigma12 + C2)
    den = (mu1 * mu1 + mu2 * mu2 + C1) * (sigma1_sq + sigma2_sq + C2)
    r = pl.reciprocal(den, approx=True)
    r = r * (2.0 - den * r)
    ssim_map = num * r                                           # (H_out, W_out)

    # Full per-channel spatial mean folded into the kernel -> one tiny store.
    red = jnp.sum(jnp.sum(ssim_map, axis=1, keepdims=True), axis=0,
                  keepdims=True)                                 # (1, 1)
    o_ref[...] = red * inv_norm


def ssim_pallas(X, Y, *, data_range=255.0, win_size=11, win_sigma=1.5,
                K=(0.01, 0.03), size_average=True, nonnegative_ssim=False,
                blur_dtype=jnp.float32):
    """SSIM forward matching the PyTorch SSIM module (NCHW inputs).

    blur_dtype=jnp.bfloat16 runs the blur matmul operands in bf16 (native MXU
    rate on v6e/v7x); accumulation and the SSIM epilogue remain f32.
    """
    if X.shape != Y.shape:
        raise ValueError('Input images should have the same dimensions.')
    if win_size % 2 != 1:
        raise ValueError('Window size should be odd.')

    # torch's ssim() squeezes singleton dims at index >= 2 before dispatch.
    spatial = tuple(s for s in X.shape[2:] if s != 1)
    if len(spatial) != X.ndim - 2:
        X = X.reshape(X.shape[:2] + spatial)
        Y = Y.reshape(Y.shape[:2] + spatial)
    if X.ndim != 4:
        raise ValueError(f'Only 4-d (N,C,H,W) inputs are supported, got {X.shape}')
        # TODO(synk): 5-D (conv3d) SSIM not implemented.

    N, C, H, W = X.shape
    # TODO(synk): torch skips blurring along dims < win_size; not implemented.
    assert H >= win_size and W >= win_size

    K1, K2 = K
    C1 = float((K1 * data_range) ** 2)
    C2 = float((K2 * data_range) ** 2)

    g = _fspecial_gauss_1d(win_size, win_sigma)
    A_h, A_w = _blur_matrices(g, H, W)
    H_out = H - win_size + 1
    W_out = W - win_size + 1
    A_h = A_h.astype(blur_dtype)
    A_w = A_w.astype(blur_dtype)

    kernel = functools.partial(
        _ssim_kernel, C1=C1, C2=C2,
        shift=float(data_range) * 0.5,
        inv_norm=1.0 / float(H_out * W_out),
        blur_dtype=blur_dtype)

    # Advisory cost estimate so XLA can overlap neighboring HLOs.
    flops = 2 * 5 * N * C * (H * W * W_out + H_out * H * W_out)
    bytes_accessed = (2 * N * C * H * W * X.dtype.itemsize
                      + (H_out * H + W * W_out) * A_h.dtype.itemsize
                      + N * C * 4)
    cost = pl.CostEstimate(flops=int(flops),
                           transcendentals=int(N * C * H_out * W_out),
                           bytes_accessed=int(bytes_accessed))

    # Explicit VMEM budget (v7x has only 64 MiB/TC): double-buffered X/Y
    # channel blocks, weights, and a generous allowance for in-kernel temps.
    plane = H * W * X.dtype.itemsize
    est = 2 * 2 * plane + 2 * (H_out * H + W * W_out) * 4 + 16 * H * W * 4 + (2 << 20)
    vmem_limit = int(min(48 << 20, max(8 << 20, est)))

    out = pl.pallas_call(
        kernel,
        out_shape=jax.ShapeDtypeStruct((N, C, 1, 1), jnp.float32),
        grid=(N, C),
        in_specs=[
            pl.BlockSpec((None, None, H, W), lambda n, c: (n, c, 0, 0)),
            pl.BlockSpec((None, None, H, W), lambda n, c: (n, c, 0, 0)),
            pl.BlockSpec((H_out, H), lambda n, c: (0, 0)),
            pl.BlockSpec((W, W_out), lambda n, c: (0, 0)),
        ],
        out_specs=pl.BlockSpec((None, None, 1, 1), lambda n, c: (n, c, 0, 0)),
        compiler_params=pltpu.CompilerParams(
            dimension_semantics=("parallel", "parallel"),
            vmem_limit_bytes=vmem_limit),
        cost_estimate=cost,
    )(X, Y, A_h, A_w)

    ssim_per_channel = out[:, :, 0, 0]                 # (N, C)
    if nonnegative_ssim:
        ssim_per_channel = jnp.maximum(ssim_per_channel, 0.0)
    if size_average:
        return jnp.mean(ssim_per_channel)              # scalar, like torch .mean()
    return jnp.mean(ssim_per_channel, axis=1)          # (N,)


def _ssim_reference(X, Y, *, data_range=255.0, win_size=11, win_sigma=1.5,
                    K=(0.01, 0.03)):
    """Plain-JAX reference (same math as the torch module, no Pallas)."""
    N, C, H, W = X.shape
    K1, K2 = K
    C1 = (K1 * data_range) ** 2
    C2 = (K2 * data_range) ** 2
    g = _fspecial_gauss_1d(win_size, win_sigma)
    A_h, A_w = _blur_matrices(g, H, W)

    def blur(t):  # t: (N, C, H, W)
        return jnp.einsum('ih,nchw,wj->ncij', A_h, t, A_w)

    mu1, mu2 = blur(X), blur(Y)
    sxx, syy, sxy = blur(X * X), blur(Y * Y), blur(X * Y)
    s1 = sxx - mu1 ** 2
    s2 = syy - mu2 ** 2
    s12 = sxy - mu1 * mu2
    cs = (2 * s12 + C2) / (s1 + s2 + C2)
    sm = (2 * mu1 * mu2 + C1) / (mu1 ** 2 + mu2 ** 2 + C1) * cs
    return jnp.mean(sm.reshape(N, C, -1).mean(-1))


if __name__ == "__main__":
    key = jax.random.PRNGKey(0)
    kx, ky = jax.random.split(key)
    N, C, H, W = 2, 3, 16, 16          # SSIM module default channel=3
    X = jax.random.uniform(kx, (N, C, H, W), dtype=jnp.float32) * 255.0
    Y = jax.random.uniform(ky, (N, C, H, W), dtype=jnp.float32) * 255.0

    ref = jax.block_until_ready(_ssim_reference(X, Y))

    # f32 MXU-operand path (default): tight parity with the torch math.
    out = jax.block_until_ready(
        ssim_pallas(X, Y, data_range=255.0, win_size=11, win_sigma=1.5))
    np.testing.assert_allclose(np.asarray(out), np.asarray(ref),
                               rtol=2e-3, atol=5e-4)

    # bf16 MXU-operand path (v6e/v7x fast path): validated loosely against the
    # f32 reference (pre-centering keeps the sigma cancellation well behaved).
    out_bf16 = jax.block_until_ready(
        ssim_pallas(X, Y, blur_dtype=jnp.bfloat16))
    np.testing.assert_allclose(np.asarray(out_bf16), np.asarray(ref),
                               rtol=0.0, atol=2e-2)

    # Exercise the non-size-averaged path too (shape check only).
    out_n = jax.block_until_ready(
        ssim_pallas(X, Y, size_average=False, nonnegative_ssim=True))
    assert out_n.shape == (N,)

    print("KERNEL_OK")
</pallas_src>

<mosaic_0001>
module attributes {stable_mosaic.version = 11 : i64} {
  func.func @_ssim_kernel(%arg0: i32, %arg1: i32, %arg2: memref<1x1x16x16xf32, #tpu.memory_space<vmem>>, %arg3: memref<1x1x16x16xf32, #tpu.memory_space<vmem>>, %arg4: memref<6x16xf32, #tpu.memory_space<vmem>>, %arg5: memref<16x6xf32, #tpu.memory_space<vmem>>, %arg6: memref<1x1x1x1xf32, #tpu.memory_space<vmem>>) attributes {dimension_semantics = [#tpu.dimension_semantics<parallel>, #tpu.dimension_semantics<parallel>], iteration_bounds = array<i64: 2, 3>, scalar_prefetch = 0 : i64, scratch_operands = 0 : i64, tpu.core_type = #tpu.core_type<tc>, window_params = [{transform_indices = @transform_0, window_bounds = array<i64: 1, 1, 16, 16>}, {transform_indices = @transform_1, window_bounds = array<i64: 1, 1, 16, 16>}, {pipeline_mode = #tpu.pipeline_mode<synchronous>, transform_indices = @transform_2, window_bounds = array<i64: 6, 16>}, {pipeline_mode = #tpu.pipeline_mode<synchronous>, transform_indices = @transform_3, window_bounds = array<i64: 16, 6>}, {transform_indices = @transform_4, window_bounds = array<i64: 1, 1, 1, 1>}]} {
    %c0 = arith.constant 0 : index
    %c0_0 = arith.constant 0 : index
    %c0_1 = arith.constant 0 : index
    %c0_2 = arith.constant 0 : index
    %0 = vector.load %arg2[%c0, %c0_0, %c0_1, %c0_2] : memref<1x1x16x16xf32, #tpu.memory_space<vmem>>, vector<1x1x16x16xf32>
    %1 = vector.shape_cast %0 : vector<1x1x16x16xf32> to vector<16x16xf32>
    %cst = arith.constant 1.275000e+02 : f32
    %2 = vector.broadcast %cst : f32 to vector<16x16xf32>
    %3 = arith.subf %1, %2 : vector<16x16xf32>
    %c0_3 = arith.constant 0 : index
    %c0_4 = arith.constant 0 : index
    %c0_5 = arith.constant 0 : index
    %c0_6 = arith.constant 0 : index
    %4 = vector.load %arg3[%c0_3, %c0_4, %c0_5, %c0_6] : memref<1x1x16x16xf32, #tpu.memory_space<vmem>>, vector<1x1x16x16xf32>
    %5 = vector.shape_cast %4 : vector<1x1x16x16xf32> to vector<16x16xf32>
    %cst_7 = arith.constant 1.275000e+02 : f32
    %6 = vector.broadcast %cst_7 : f32 to vector<16x16xf32>
    %7 = arith.subf %5, %6 : vector<16x16xf32>
    %c0_8 = arith.constant 0 : index
    %c0_9 = arith.constant 0 : index
    %8 = vector.load %arg4[%c0_8, %c0_9] : memref<6x16xf32, #tpu.memory_space<vmem>>, vector<6x16xf32>
    %c0_10 = arith.constant 0 : index
    %c0_11 = arith.constant 0 : index
    %9 = vector.load %arg5[%c0_10, %c0_11] : memref<16x6xf32, #tpu.memory_space<vmem>>, vector<16x6xf32>
    %cst_12 = arith.constant dense<0.000000e+00> : vector<16x6xf32>
    %10 = tpu.matmul %3, %9, %cst_12 {dimension_numbers = #tpu.dot_dimension_numbers<[1], [0], [0], [1], [0, 0, 1, 1], [], []>} : vector<16x16xf32>, vector<16x6xf32>, vector<16x6xf32> -> vector<16x6xf32>
    %cst_13 = arith.constant dense<0.000000e+00> : vector<6x6xf32>
    %11 = tpu.matmul %8, %10, %cst_13 {dimension_numbers = #tpu.dot_dimension_numbers<[1], [0], [0], [1], [0, 0, 1, 1], [], []>} : vector<6x16xf32>, vector<16x6xf32>, vector<6x6xf32> -> vector<6x6xf32>
    %cst_14 = arith.constant dense<0.000000e+00> : vector<16x6xf32>
    %12 = tpu.matmul %7, %9, %cst_14 {dimension_numbers = #tpu.dot_dimension_numbers<[1], [0], [0], [1], [0, 0, 1, 1], [], []>} : vector<16x16xf32>, vector<16x6xf32>, vector<16x6xf32> -> vector<16x6xf32>
    %cst_15 = arith.constant dense<0.000000e+00> : vector<6x6xf32>
    %13 = tpu.matmul %8, %12, %cst_15 {dimension_numbers = #tpu.dot_dimension_numbers<[1], [0], [0], [1], [0, 0, 1, 1], [], []>} : vector<6x16xf32>, vector<16x6xf32>, vector<6x6xf32> -> vector<6x6xf32>
    %14 = arith.mulf %3, %3 : vector<16x16xf32>
    %cst_16 = arith.constant dense<0.000000e+00> : vector<16x6xf32>
    %15 = tpu.matmul %14, %9, %cst_16 {dimension_numbers = #tpu.dot_dimension_numbers<[1], [0], [0], [1], [0, 0, 1, 1], [], []>} : vector<16x16xf32>, vector<16x6xf32>, vector<16x6xf32> -> vector<16x6xf32>
    %cst_17 = arith.constant dense<0.000000e+00> : vector<6x6xf32>
    %16 = tpu.matmul %8, %15, %cst_17 {dimension_numbers = #tpu.dot_dimension_numbers<[1], [0], [0], [1], [0, 0, 1, 1], [], []>} : vector<6x16xf32>, vector<16x6xf32>, vector<6x6xf32> -> vector<6x6xf32>
    %17 = arith.mulf %11, %11 : vector<6x6xf32>
    %18 = arith.subf %16, %17 : vector<6x6xf32>
    %19 = arith.mulf %7, %7 : vector<16x16xf32>
    %cst_18 = arith.constant dense<0.000000e+00> : vector<16x6xf32>
    %20 = tpu.matmul %19, %9, %cst_18 {dimension_numbers = #tpu.dot_dimension_numbers<[1], [0], [0], [1], [0, 0, 1, 1], [], []>} : vector<16x16xf32>, vector<16x6xf32>, vector<16x6xf32> -> vector<16x6xf32>
    %cst_19 = arith.constant dense<0.000000e+00> : vector<6x6xf32>
    %21 = tpu.matmul %8, %20, %cst_19 {dimension_numbers = #tpu.dot_dimension_numbers<[1], [0], [0], [1], [0, 0, 1, 1], [], []>} : vector<6x16xf32>, vector<16x6xf32>, vector<6x6xf32> -> vector<6x6xf32>
    %22 = arith.mulf %13, %13 : vector<6x6xf32>
    %23 = arith.subf %21, %22 : vector<6x6xf32>
    %24 = arith.mulf %3, %7 : vector<16x16xf32>
    %cst_20 = arith.constant dense<0.000000e+00> : vector<16x6xf32>
    %25 = tpu.matmul %24, %9, %cst_20 {dimension_numbers = #tpu.dot_dimension_numbers<[1], [0], [0], [1], [0, 0, 1, 1], [], []>} : vector<16x16xf32>, vector<16x6xf32>, vector<16x6xf32> -> vector<16x6xf32>
    %cst_21 = arith.constant dense<0.000000e+00> : vector<6x6xf32>
    %26 = tpu.matmul %8, %25, %cst_21 {dimension_numbers = #tpu.dot_dimension_numbers<[1], [0], [0], [1], [0, 0, 1, 1], [], []>} : vector<6x16xf32>, vector<16x6xf32>, vector<6x6xf32> -> vector<6x6xf32>
    %27 = arith.mulf %11, %13 : vector<6x6xf32>
    %28 = arith.subf %26, %27 : vector<6x6xf32>
    %cst_22 = arith.constant 1.275000e+02 : f32
    %29 = vector.broadcast %cst_22 : f32 to vector<6x6xf32>
    %30 = arith.addf %11, %29 : vector<6x6xf32>
    %cst_23 = arith.constant 1.275000e+02 : f32
    %31 = vector.broadcast %cst_23 : f32 to vector<6x6xf32>
    %32 = arith.addf %13, %31 : vector<6x6xf32>
    %cst_24 = arith.constant 2.000000e+00 : f32
    %33 = vector.broadcast %cst_24 : f32 to vector<6x6xf32>
    %34 = arith.mulf %33, %30 : vector<6x6xf32>
    %35 = arith.mulf %34, %32 : vector<6x6xf32>
    %cst_25 = arith.constant 6.502500e+00 : f32
    %36 = vector.broadcast %cst_25 : f32 to vector<6x6xf32>
    %37 = arith.addf %35, %36 : vector<6x6xf32>
    %cst_26 = arith.constant 2.000000e+00 : f32
    %38 = vector.broadcast %cst_26 : f32 to vector<6x6xf32>
    %39 = arith.mulf %38, %28 : vector<6x6xf32>
    %cst_27 = arith.constant 5.852250e+01 : f32
    %40 = vector.broadcast %cst_27 : f32 to vector<6x6xf32>
    %41 = arith.addf %39, %40 : vector<6x6xf32>
    %42 = arith.mulf %37, %41 : vector<6x6xf32>
    %43 = arith.mulf %30, %30 : vector<6x6xf32>
    %44 = arith.mulf %32, %32 : vector<6x6xf32>
    %45 = arith.addf %43, %44 : vector<6x6xf32>
    %cst_28 = arith.constant 6.502500e+00 : f32
    %46 = vector.broadcast %cst_28 : f32 to vector<6x6xf32>
    %47 = arith.addf %45, %46 : vector<6x6xf32>
    %48 = arith.addf %18, %23 : vector<6x6xf32>
    %cst_29 = arith.constant 5.852250e+01 : f32
    %49 = vector.broadcast %cst_29 : f32 to vector<6x6xf32>
    %50 = arith.addf %48, %49 : vector<6x6xf32>
    %51 = arith.mulf %47, %50 : vector<6x6xf32>
    %52 = tpu.reciprocal %51 {approx = true} : vector<6x6xf32> -> vector<6x6xf32>
    %53 = arith.mulf %51, %52 : vector<6x6xf32>
    %cst_30 = arith.constant 2.000000e+00 : f32
    %54 = vector.broadcast %cst_30 : f32 to vector<6x6xf32>
    %55 = arith.subf %54, %53 : vector<6x6xf32>
    %56 = arith.mulf %52, %55 : vector<6x6xf32>
    %57 = arith.mulf %42, %56 : vector<6x6xf32>
    %cst_31 = arith.constant dense<0.000000e+00> : vector<6xf32>
    %58 = vector.multi_reduction <add>, %57, %cst_31 [1] : vector<6x6xf32> to vector<6xf32>
    %59 = vector.shape_cast %58 : vector<6xf32> to vector<6x1xf32>
    %cst_32 = arith.constant dense<0.000000e+00> : vector<1xf32>
    %60 = vector.multi_reduction <add>, %59, %cst_32 [0] : vector<6x1xf32> to vector<1xf32>
    %61 = vector.shape_cast %60 : vector<1xf32> to vector<1x1xf32>
    %cst_33 = arith.constant 0.027777778 : f32
    %62 = vector.broadcast %cst_33 : f32 to vector<1x1xf32>
    %63 = arith.mulf %61, %62 : vector<1x1xf32>
    %c0_34 = arith.constant 0 : index
    %c0_35 = arith.constant 0 : index
    %c0_36 = arith.constant 0 : index
    %c0_37 = arith.constant 0 : index
    %64 = vector.load %arg6[%c0_34, %c0_35, %c0_36, %c0_37] : memref<1x1x1x1xf32, #tpu.memory_space<vmem>>, vector<1x1x1x1xf32>
    %65 = vector.shape_cast %64 : vector<1x1x1x1xf32> to vector<1x1xf32>
    %66 = vector.shape_cast %63 : vector<1x1xf32> to vector<1x1x1x1xf32>
    tpu.vector_store %arg6[%c0_34, %c0_35, %c0_36, %c0_37], %66 {strides = array<i32>} : memref<1x1x1x1xf32, #tpu.memory_space<vmem>>, vector<1x1x1x1xf32>,
    return
  }
  func.func @transform_0(%arg0: i32, %arg1: i32) -> (i32, i32, i32, i32) {
    %c0_i32 = arith.constant 0 : i32
    %c0_i32_0 = arith.constant 0 : i32
    %c0_i32_1 = arith.constant 0 : i32
    return %arg0, %arg1, %c0_i32, %c0_i32_0 : i32, i32, i32, i32
  }
  func.func @transform_1(%arg0: i32, %arg1: i32) -> (i32, i32, i32, i32) {
    %c0_i32 = arith.constant 0 : i32
    %c0_i32_0 = arith.constant 0 : i32
    %c0_i32_1 = arith.constant 0 : i32
    return %arg0, %arg1, %c0_i32, %c0_i32_0 : i32, i32, i32, i32
  }
  func.func @transform_2(%arg0: i32, %arg1: i32) -> (i32, i32) {
    %c0_i32 = arith.constant 0 : i32
    %c0_i32_0 = arith.constant 0 : i32
    %c0_i32_1 = arith.constant 0 : i32
    return %c0_i32, %c0_i32_0 : i32, i32
  }
  func.func @transform_3(%arg0: i32, %arg1: i32) -> (i32, i32) {
    %c0_i32 = arith.constant 0 : i32
    %c0_i32_0 = arith.constant 0 : i32
    %c0_i32_1 = arith.constant 0 : i32
    return %c0_i32, %c0_i32_0 : i32, i32
  }
  func.func @transform_4(%arg0: i32, %arg1: i32) -> (i32, i32, i32, i32) {
    %c0_i32 = arith.constant 0 : i32
    %c0_i32_0 = arith.constant 0 : i32
    %c0_i32_1 = arith.constant 0 : i32
    return %arg0, %arg1, %c0_i32, %c0_i32_0 : i32, i32, i32, i32
  }
}

</mosaic_0001>

<bundles_post_ra>
// kernel: tpu_custom_call.1
= control target key start
LH: loop header
LB: loop body
LE: loop exit
PB: predicated region body
PF: predicated region fallthrough
CT: control target
= control target key end

     0   :  { %s1781_s0 = inlined_call_operand.hbm [shape: f32[2,3,16,16], index: 0, kind: input, shape index: {}]   ;;  %s1782_s1 = inlined_call_operand.hbm [shape: f32[2,3,16,16], index: 1, kind: input, shape index: {}]   ;;  %s1783_s2 = inlined_call_operand.vmem [shape: f32[6,16], index: 2, kind: input, shape index: {}]   ;;  %s1784_s3 = inlined_call_operand.vmem [shape: f32[16,6], index: 3, kind: input, shape index: {}]   ;;  %s1785_s4 = inlined_call_operand.vmem [shape: f32[2,3,1,1], index: 4, kind: output, shape index: {}]  }
   0x1   :  { %1787 = sst [smem:[#allocation9_spill]] %s1781_s0 }
   0x2   :  { %9 = vsyncpa [#allocation3], 0 }
   0x3   :  { %11 = vsyncpa [#allocation3 + $0x1], 0 }
   0x4   :  { %12 = vsyncpa [#allocation5], 0 }
   0x5   :  { %14 = vsyncpa [#allocation5 + $0x1], 0  ;;  %s1599_s15 = smov 0   ;;  %s1601_s16 = smov 0  }
   0x6   :  { %s1603_s17 = smov 0   ;;  %s1605_s18 = smov 0  }
   0x7   :  { %s1607_s19 = smov 0   ;;  %s1609_s20 = smov 0  }
   0x8   :  { %s1611_s21 = smov 0   ;;  %s1613_s22 = smov 0  }
   0x9 LB: > { %s1216_s23 = sadd.s32 4294967295, %s1566_s22   ;;  %s29_s24 = sadd.s32 1, %s1558_s20  ;;  %s1566_s22 = sphi %s1613_s22, %s20_s22   ;;  %s1562_s21 = sphi %s1611_s21, %s1801_s21   ;;  %s1558_s20 = sphi %s1609_s20, %s1800_s20   ;;  %s1554_s19 = sphi %s1607_s19, %s1799_s19   ;;  %s1550_s18 = sphi %s1605_s18, %s1798_s18   ;;  %s1546_s17 = sphi %s1603_s17, %s1797_s17   ;;  %s1542_s16 = sphi %s1601_s16, %s1796_s16   ;;  %s1538_s15 = sphi %s1599_s15, %s1795_s15  }
   0xa   : > { %p30_p0 = scmp.ge.s32.totalorder %s29_s24, 3  ;;  %s32_s25 = sadd.s32 1, %s1562_s21 }
   0xb   : > { %s41_s26 = sadd.s32 1, %s1546_s17  ;;  %p48_p1 = scmp.ne.s32.totalorder %s1546_s17, %s1542_s16 }
   0xc   : > { %s1803_s24 = smov (%p30_p0, %s29_s24), 0  ;;  %s1805_s25 = smov (!%p30_p0, %s32_s25), %s1562_s21 }
   0xd   : > { %s37_s27 = ssub.s32 %s1558_s20, %s1803_s24  ;;  %p49_p2 = scmp.eq.s32.totalorder %s1566_s22, 0 }
   0xe   : > { %p34_p3 = scmp.ge.s32.totalorder %s1805_s25, 2  ;;  %p54_p4 = scmp.ne.s32.totalorder %s1542_s16, %s1538_s15 }
   0xf   : > { %p1650_p5 = por %p49_p2, %p48_p1  ;;  %p55_p6 = scmp.eq.s32.totalorder %s1216_s23, 0 }
  0x10   : > { %s1807_s25 = smov (%p34_p3, %s1805_s25), 0  ;;  %p1369_p8 = scmp.lt.s32.totalorder %s1566_s22, 6 }
  0x11   : > { %1789 = sst [smem:[#allocation8_spill]] %s1807_s25  ;;  %p1656_p7 = por %p55_p6, %p54_p4 }
  0x12   : > { %s36_s30 = ssub.s32 %s1562_s21, %s1807_s25  ;;  %s1664_s6 = sand.u32 1, %s1546_s17  }
  0x13   : > { %s38_s5 = sor.u32 %s37_s27, %s36_s30  ;;  %s1220_s7 = sshll.u32 %s1664_s6, 4 }
  0x14   : > { %p39_p9 = scmp.eq.s32.totalorder %s38_s5, 0  ;;  %s1221_s8 = sshll.u32 %s1558_s20, 1 }
  0x15   : > { %s1355_s10 = smul.u32 6, %s1562_s21  ;;  %s186_s11 = scalar_lea.vmem [#allocation2], %s1220_s7 }
  0x16   : > { %s1669_s9 = scalar_select %p39_p9, %s1546_s17, %s41_s26  }
  0x17   : > { %s195_s12 = sshll.u32 %s186_s11, 4  ;;  %p1676_p10 = pnand %p1369_p8, %p1650_p5  ;;  %s196_s12 = int_to_ptr.vmem [resolvable:$true] %s195_s12 }
  0x18   : > { %s192_s14 = sadd.s32 %s1355_s10, %s1221_s8  ;;  %s1792_s0 = sld [smem:[#allocation9_spill]] }
  0x19   : > { %s1222_s15 = sshll.u32 %s192_s14, 7  ;;  %p1226_p11 = scmp.ge.s32.totalorder %s1566_s22, 1 }
  0x1a   : > { %s183_s26 = scalar_lea.sflag [#allocation3], %s1664_s6  ;;  %p1442_p12 = pneg %p1676_p10 }
  0x1b   : > { %s1453_s5 = scalar_lea.vmem %s196_s12, 256  ;;  %s1568_s28 = smov [#allocation2]  }
  0x1c   : > { %p1454_p13 = scmp.ne.s32.totalorder %s196_s12, %s1453_s5  ;;  %s1458_s11 = sshll.u32 %s1568_s28, 4  ;;  %s1459_s11 = int_to_ptr.vmem [resolvable:$false] %s1458_s11 }
  0x1d   : > { %s1460_s8 = scalar_lea.vmem %s1459_s11, 512  ;;  %p1461_p2 = scmp.lt.s32.totalorder %s196_s12, %s1459_s11 }
  0x1e   : > { %s194_s30 = scalar_lea.hbm %s1792_s0, %s1222_s15  ;;  %p1456_p0 = pnand %p1454_p13, %p1442_p12 }
  0x1f   : > { %p1462_p3 = scmp.lt.s32.totalorder %s1460_s8, %s1453_s5 }
  0x20   : > { %p1457_p1 = pneg %p1456_p0 }
  0x21   : > { %p1463_p4 = por %p1462_p3, %p1461_p2 }
  0x23   : > { %p1464_p5 = pnand %p1463_p4, %p1457_p1 }
  0x25   : > { %1467 = shalt.err (!%p1464_p5)
}
  0x26   : > { %s1569_s10 = smov 128   ;;  %s1570_s14 = smov 8  }
  0x27   : > { %1365 = dma.hbm_to_vmem [thread:$0]  (!%p1676_p10), %s194_s30, 256, %s196_s12, %s183_s26, %s1569_s10, %s1569_s10, %s1570_s14  }
  0x28   : > { %p226_p6 = scmp.lt.s32.totalorder %s1566_s22, 7  ;;  %s217_s28 = scalar_lea.hbm %s1782_s1, %s1222_s15 }
  0x29   : > { %s209_s11 = scalar_lea.vmem [#allocation4], %s1220_s7  ;;  %s206_s0 = scalar_lea.sflag [#allocation5], %s1664_s6 }
  0x2a   : > { %p1698_p8 = pnand %p1226_p11, %p226_p6  ;;  %s218_s8 = sshll.u32 %s209_s11, 4  ;;  %s219_s8 = int_to_ptr.vmem [resolvable:$true] %s218_s8 }
  0x2b   : > { %s1481_s25 = scalar_lea.vmem %s219_s8, 256  ;;  %s1571_s12 = smov [#allocation4]  }
  0x2c   : > { %p1482_p9 = scmp.ne.s32.totalorder %s219_s8, %s1481_s25  ;;  %s1486_s30 = sshll.u32 %s1571_s12, 4  ;;  %s1487_s30 = int_to_ptr.vmem [resolvable:$false] %s1486_s30 }
  0x2d   : > { %s1488_s15 = scalar_lea.vmem %s1487_s30, 512  ;;  %p1489_p1 = scmp.lt.s32.totalorder %s219_s8, %s1487_s30 }
  0x2e   : > { %p1484_p13 = pnand %p1482_p9, %p1442_p12  ;;  %p1490_p11 = scmp.lt.s32.totalorder %s1488_s15, %s1481_s25 }
  0x30   : > { %p1485_p0 = pneg %p1484_p13  ;;  %p1491_p2 = por %p1490_p11, %p1489_p1 }
  0x32   : > { %p1492_p3 = pnand %p1491_p2, %p1485_p0 }
  0x34   : > { %1495 = shalt.err (!%p1492_p3)
}
  0x35   : > { %1368 = dma.hbm_to_vmem [thread:$0]  (!%p1676_p10), %s217_s28, 256, %s219_s8, %s206_s0, %s1569_s10, %s1569_s10, %s1570_s14  }
  0x36   : > { %230 = sbr.rel (%p1698_p8) target bundleno = 653 (0x28d), region = 36  ;;  %s232_s6 = sand.u32 (!%p1698_p8), 1, %s1542_s16  }
  0x37   : > { %s1227_s7 = sshll.u32 (!%p1698_p8), %s232_s6, 4  ;;  %s233_s26 = scalar_lea.sflag (!%p1698_p8), [#allocation3], %s232_s6 }
  0x38   : > { %s236_s23 = scalar_lea.vmem (!%p1698_p8), [#allocation2], %s1227_s7 }
  0x3b   : > { %1529 = dma.done.wait (%p1656_p7), %s233_s26, 256  }
  0x3c   : > { %1531 = vsyncadd (%p1656_p7), %s233_s26, 4294967040  ;;  %s242_s25 = scalar_lea.sflag [#allocation5], %s232_s6  ;;  %s245_s27 = scalar_lea.vmem [#allocation4], %s1227_s7 }
  0x3d   : > { %1533 = dma.done.wait (%p1656_p7), %s242_s25, 256  }
  0x3e   : > { %1535 = vsyncadd (%p1656_p7), %s242_s25, 4294967040  ;;  %v294_v0 = vld [vmem:[%s1784_s3 + $0x8] sm:$0xff]  ;;  %v293_v1 = vld [vmem:[%s1784_s3] sm:$0xff]  ;;  %vm295_vm0 = vcmask 130048   ;;  %v1572_v16 = vmov 0.0   ;;  %vm1573_vm1 = vmmov 0  }
  0x3f   : > { %v284_v2 = vld [vmem:[%s236_s23] sm:$0xff]  ;;  %1285 = vmatprep.subr.mxu0 %v294_v0  ;;  %v285_v4 = vld [vmem:[%s236_s23 + $0x8] sm:$0xff]  ;;  %1292 = vmatprep.subr.mxu1 %v1572_v16  ;;  %vm1086_vm2 = vcmask 46080   ;;  %p277_p7 = scmp.lt.s32.totalorder %s1554_s19, 1  ;;  %vm1090_vm3 = vcmask 1045504   ;;  %p279_p10 = scmp.lt.s32.totalorder %s1550_s18, 2 }
  0x40   : > { %v1229_v3 = vadd.f32 -127.5, %v284_v2  ;;  %v288_v5 = vld [vmem:[%s245_s27] sm:$0xff]  ;;  %1286 = vmatpush3.msra.mxu0 %v294_v0  ;;  %v1230_v6 = vadd.f32 -127.5, %v285_v4  ;;  %v289_v8 = vld [vmem:[%s245_s27 + $0x8] sm:$0xff]  ;;  %1296 = vmatprep.mubr.msk.f32.mxu1 %vm1573_vm1, %v1572_v16  ;;  %vm1099_vm4 = vcmask 0  }
  0x41   : > { %v1231_v7 = vadd.f32 -127.5, %v288_v5  ;;  %1287 = vmatprep.subr.mxu0 %v293_v1  ;;  %v1232_v9 = vadd.f32 -127.5, %v289_v8  ;;  %v292_v18 = vld [vmem:[%s1783_s2] sm:$0x3f]  ;;  %s1809_s19 = smov (!%p277_p7, %s1554_s19), 1  ;;  %s1811_s18 = smov (!%p279_p10, %s1550_s18), 2 }
  0x42   : > { %1289 = vmatprep.mubr.msk.f32.mxu0 %vm295_vm0, %v1229_v3  ;;  %1288 = vmatpush3.msra.mxu0 %v293_v1  ;;  %v601_v10 = vmul.f32 %v1229_v3, %v1229_v3  ;;  %v602_v11 = vmul.f32 %v1230_v6, %v1230_v6  ;;  %s1357_s5 = smul.u32 3, %s1809_s19 }
  0x43   : > { %1290 = vmatmul.mubr.msk.f32.vlgmr.msra.gmra.mxu0 %vm295_vm0, %v1230_v6  ;;  %1299 = vmatprep.subr.mxu0 %v294_v0  ;;  %v756_v12 = vmul.f32 %v1231_v7, %v1231_v7  ;;  %v757_v13 = vmul.f32 %v1232_v9, %v1232_v9  ;;  %v911_v14 = vmul.f32 %v1231_v7, %v1229_v3 }
  0x44   : > { %1300 = vmatpush3.msra.mxu0 %v294_v0  ;;  %1303 = vmatprep.mubr.msk.f32.mxu0 %vm295_vm0, %v1231_v7  ;;  %v912_v15 = vmul.f32 %v1232_v9, %v1230_v6  ;;  %s282_s11 = sadd.s32 %s1357_s5, %s1811_s18 }
  0x45   : > { %1301 = vmatprep.subr.mxu0 %v293_v1  ;;  %s283_s30 = scalar_lea.vmem %s1785_s4, %s282_s11 }
  0x46   : > { %1302 = vmatpush3.msra.mxu0 %v293_v1 }
  0x47   : > { %1304 = vmatmul.mubr.msk.f32.vlgmr.msra.gmra.mxu0 %vm295_vm0, %v1232_v9  ;;  %1313 = vmatprep.subr.mxu0 %v294_v0 }
  0x48   : > { %1314 = vmatpush3.msra.mxu0 %v294_v0  ;;  %1317 = vmatprep.mubr.msk.f32.mxu0 %vm295_vm0, %v601_v10 }
  0x49   : > { %1315 = vmatprep.subr.mxu0 %v293_v1 }
  0x4a   : > { %1316 = vmatpush3.msra.mxu0 %v293_v1 }
  0x4b   : > { %1318 = vmatmul.mubr.msk.f32.vlgmr.msra.gmra.mxu0 %vm295_vm0, %v602_v11  ;;  %1327 = vmatprep.subr.mxu0 %v294_v0 }
  0x4c   : > { %1328 = vmatpush3.msra.mxu0 %v294_v0  ;;  %1331 = vmatprep.mubr.msk.f32.mxu0 %vm295_vm0, %v756_v12 }
  0x4d   : > { %1329 = vmatprep.subr.mxu0 %v293_v1 }
  0x4e   : > { %1330 = vmatpush3.msra.mxu0 %v293_v1 }
  0x4f   : > { %1332 = vmatmul.mubr.msk.f32.vlgmr.msra.gmra.mxu0 %vm295_vm0, %v757_v13  ;;  %1341 = vmatprep.subr.mxu0 %v294_v0 }
  0x50   : > { %1342 = vmatpush3.msra.mxu0 %v294_v0  ;;  %1345 = vmatprep.mubr.msk.f32.mxu0 %vm295_vm0, %v911_v14 }
  0x51   : > { %1343 = vmatprep.subr.mxu0 %v293_v1 }
  0x52   : > { %1344 = vmatpush3.msra.mxu0 %v293_v1 }
  0x53   : > { %1346 = vmatmul.mubr.msk.f32.vlgmr.msra.gmra.mxu0 %vm295_vm0, %v912_v15 }
 0x103   : > { %v1291_v17 = vpop.f32.mrf.mxu0 }
 0x104   : > { %1293 = vmatpush3.msra.mxu1 %v1291_v17 }
 0x105   : > { %v368_v19 = vpop.f32.mrf.mxu0  ;;  %1294 = vmatprep.subr.mxu1 %v1572_v16 }
 0x106   : > { %1295 = vmatpush3.msra.mxu1 %v368_v19 }
 0x107   : > { %1297 = vmatmul.mubr.msk.f32.vlgmr.msra.gmra.mxu1 %vm295_vm0, %v292_v18  ;;  %v1305_v20 = vpop.f32.mrf.mxu0  ;;  %1306 = vmatprep.subr.mxu1 %v1572_v16 }
 0x108   : > { %1307 = vmatpush3.msra.mxu1 %v1305_v20  ;;  %1310 = vmatprep.mubr.msk.f32.mxu1 %vm1573_vm1, %v1572_v16 }
 0x109   : > { %v522_v21 = vpop.f32.mrf.mxu0  ;;  %1308 = vmatprep.subr.mxu1 %v1572_v16 }
 0x10a   : > { %1309 = vmatpush3.msra.mxu1 %v522_v21 }
 0x10b   : > { %1311 = vmatmul.mubr.msk.f32.vlgmr.msra.gmra.mxu1 %vm295_vm0, %v292_v18  ;;  %v1319_v22 = vpop.f32.mrf.mxu0  ;;  %1320 = vmatprep.subr.mxu1 %v1572_v16 }
 0x10c   : > { %1321 = vmatpush3.msra.mxu1 %v1319_v22  ;;  %1324 = vmatprep.mubr.msk.f32.mxu1 %vm1573_vm1, %v1572_v16 }
 0x10d   : > { %v675_v23 = vpop.f32.mrf.mxu0  ;;  %1322 = vmatprep.subr.mxu1 %v1572_v16 }
 0x10e   : > { %1323 = vmatpush3.msra.mxu1 %v675_v23 }
 0x10f   : > { %1325 = vmatmul.mubr.msk.f32.vlgmr.msra.gmra.mxu1 %vm295_vm0, %v292_v18  ;;  %v1333_v24 = vpop.f32.mrf.mxu0  ;;  %1334 = vmatprep.subr.mxu1 %v1572_v16 }
 0x110   : > { %1335 = vmatpush3.msra.mxu1 %v1333_v24  ;;  %1338 = vmatprep.mubr.msk.f32.mxu1 %vm1573_vm1, %v1572_v16 }
 0x111   : > { %v830_v25 = vpop.f32.mrf.mxu0  ;;  %1336 = vmatprep.subr.mxu1 %v1572_v16 }
 0x112   : > { %1337 = vmatpush3.msra.mxu1 %v830_v25 }
 0x113   : > { %1339 = vmatmul.mubr.msk.f32.vlgmr.msra.gmra.mxu1 %vm295_vm0, %v292_v18  ;;  %v1347_v26 = vpop.f32.mrf.mxu0  ;;  %1348 = vmatprep.subr.mxu1 %v1572_v16 }
 0x114   : > { %1349 = vmatpush3.msra.mxu1 %v1347_v26  ;;  %1352 = vmatprep.mubr.msk.f32.mxu1 %vm1573_vm1, %v1572_v16 }
 0x115   : > { %v985_v27 = vpop.f32.mrf.mxu0  ;;  %1350 = vmatprep.subr.mxu1 %v1572_v16 }
 0x116   : > { %1351 = vmatpush3.msra.mxu1 %v985_v27 }
 0x117   : > { %1353 = vmatmul.mubr.msk.f32.vlgmr.msra.gmra.mxu1 %vm295_vm0, %v292_v18 }
 0x1c7   : > { %v446_v28 = vpop.f32.mrf.mxu1 }
 0x1c8   : > { %v1066_v33 = vadd.f32 127.5, %v446_v28  ;;  %v754_v38 = vmul.f32 %v446_v28, %v446_v28 }
 0x1c9   : > { %v1298_v29 = vpop.f32.mrf.mxu1 }
 0x1ca   : > { %v1074_v37 = vmul.f32 %v1066_v33, %v1066_v33  ;;  %v1068_v53 = vmul.f32 2.0, %v1066_v33 }
 0x1cb   : > { %v597_v30 = vpop.f32.mrf.mxu1 }
 0x1cc   : > { %v1067_v31 = vadd.f32 127.5, %v597_v30  ;;  %v909_v39 = vmul.f32 %v597_v30, %v597_v30  ;;  %v1064_v51 = vmul.f32 %v597_v30, %v446_v28 }
 0x1cd   : > { %v1312_v32 = vpop.f32.mrf.mxu1 }
 0x1ce   : > { %v1075_v35 = vmul.f32 %v1067_v31, %v1067_v31  ;;  %v1069_v55 = vmul.f32 %v1068_v53, %v1067_v31 }
 0x1cf   : > { %v750_v34 = vpop.f32.mrf.mxu1 }
 0x1d0   : > { %v755_v41 = vsub.f32 %v750_v34, %v754_v38  ;;  %v1076_v43 = vadd.f32 %v1075_v35, %v1074_v37  ;;  %v1070_v59 = vadd.f32 6.5025, %v1069_v55 }
 0x1d1   : > { %v1326_v36 = vpop.f32.mrf.mxu1 }
 0x1d2   : > { %v1077_v47 = vadd.f32 6.5025, %v1076_v43 }
 0x1d3   : > { %v905_v40 = vpop.f32.mrf.mxu1 }
 0x1d4   : > { %v910_v42 = vsub.f32 %v905_v40, %v909_v39 }
 0x1d5   : > { %v1340_v44 = vpop.f32.mrf.mxu1 }
 0x1d6   : > { %v1078_v45 = vadd.f32 %v910_v42, %v755_v41 }
 0x1d7   : > { %v1060_v46 = vpop.f32.mrf.mxu1 }
 0x1d8   : > { %v1079_v48 = vadd.f32 58.5225, %v1078_v45  ;;  %v1065_v52 = vsub.f32 %v1060_v46, %v1064_v51 }
 0x1d9   : > { %v1354_v49 = vpop.f32.mrf.mxu1 }
 0x1da   : > { %v1080_v50 = vmul.f32 %v1079_v48, %v1077_v47  ;;  %v1071_v54 = vmul.f32 2.0, %v1065_v52 }
 0x1dc   : > { %1438 = vrcp.f32 %v1080_v50  ;;  %v1072_v57 = vadd.f32 58.5225, %v1071_v54 }
 0x1de   : > { %v1073_v61 = vmul.f32 %v1072_v57, %v1070_v59 }
 0x1e9   : > { %v1439_v56 = vpop.eup %1438 }
 0x1ea   : > { %v1082_v58 = vmul.f32 %v1439_v56, %v1080_v50 }
 0x1ec   : > { %v1083_v60 = vsub.f32 2.0, %v1082_v58 }
 0x1ee   : > { %v1084_v62 = vmul.f32 %v1439_v56, %v1083_v60 }
 0x1f0   : > { %v1085_v63 = vmul.f32 %v1084_v62, %v1073_v61 }
 0x1f2   : > { %v1087_v0 = vsel %vm1086_vm2, %v1085_v63, 0.0 }
 0x1f3   : > { %1088 = vadd.xlane.f32.xlu0 %v1087_v0 }
 0x27c   : > { %v1089_v1 = vpop.xlane.xlu0 %1088 }
 0x27d   : > { %v1091_v2 = vsel %vm1090_vm3, %v1089_v1, 0.0 }
 0x27e   : > { %v1092_v3 = vrot.slane %v1091_v2, 4 }
 0x280   : > { %v1093_v4 = vadd.f32 %v1092_v3, %v1091_v2 }
 0x282   : > { %v1094_v5 = vrot.slane %v1093_v4, 2 }
 0x284   : > { %v1095_v6 = vadd.f32 %v1094_v5, %v1093_v4 }
 0x286   : > { %v1096_v7 = vrot.slane %v1095_v6, 1 }
 0x288   : > { %v1097_v8 = vadd.f32 %v1096_v7, %v1095_v6 }
 0x28a   : > { %v1098_v9 = vmul.f32 0.027777778, %v1097_v8 }
 0x28c   : > { %1100 = vst.msk [vmem:[%s283_s30] sm:$0x1] %vm1099_vm4, %v1098_v9 }
 0x28d PF: > { %s20_s22 = sadd.s32 1, %s1566_s22   ;;  %s1794_s6 = sld [smem:[#allocation8_spill]] }
 0x28e   : > { %p17_p12 = scmp.ge.s32.totalorder %s20_s22, 8   ;;  %s1795_s15 = smov %s1542_s16 }
 0x28f   : > { %s1796_s16 = smov %s1546_s17  ;;  %s1797_s17 = smov %s1669_s9 }
 0x290   : > { %s1798_s18 = smov %s1558_s20  ;;  %s1799_s19 = smov %s1562_s21 }
 0x291   : > { %s1800_s20 = smov %s1803_s24  ;;  %19 = sbr.rel (!%p17_p12) target bundleno = 9 (0x9), region = 89 }
 0x293   : > { %s1801_s21 = smov %s1794_s6 }
 0x296   :  { %1126 = vsyncpa [#allocation3], 1 }
 0x297   :  { %1128 = vsyncpa [#allocation3 + $0x1], 1 }
 0x298   :  { %1129 = vsyncpa [#allocation5], 1 }
 0x299   :  { %1131 = vsyncpa [#allocation5 + $0x1], 1 }

</bundles_post_ra>
